<compile_context>
chip_gen: v7x
topology: tpu7x:2x2x1
jax: 0.10.0
libtpu: 0.0.40
codegen_flags: <defaults>
</compile_context>

<pallas_src>
import functools

import jax
import jax.numpy as jnp
from jax.experimental import pallas as pl
from jax.experimental.pallas import tpu as pltpu

_LANE = 128  # TPU lane width; batch tiles are multiples of this.


def _round_up(x, m):
    return ((x + m - 1) // m) * m


# ----------------------------------------------------------------------------
# Kernel: whole MLP (5 Linear layers + 1 ResidualBlock, Swish) fused.
# Layout inside the kernel: features on sublanes, batch on lanes.
#   x_ref      : [2, T]        (x, t) pairs, transposed
#   w1_ref     : [32, 2]       Linear(2, 32) weight, [out, in]
#   wstack_ref : [5, 32, 32]   W2, W3, RW1, RW2, W4, each [out, in]
#   w5_ref     : [1, 32]       final Linear(32, 1) weight, [out, in]
#   b_ref      : [32, 8]       bias table: cols 0..5 = b1,b2,b3,rb1,rb2,b4,
#                              col 6 row 0 = b5, col 7 = zero padding
#   o_ref      : [1, T]
# ----------------------------------------------------------------------------
def _pinn_v2_kernel(x_ref, w1_ref, wstack_ref, w5_ref, b_ref, o_ref, *, approx):
    def swish(v):
        # Swish(v) = v * sigmoid(v) = v * 1/(1 + exp(-v)); exp and reciprocal
        # both run on the EUP (approx reciprocal = cheap EUP path).
        return v * pl.reciprocal(1.0 + jnp.exp(-v), approx=approx)

    def bias_col(k):
        # [32, 1] column, broadcasts over the batch (lane) axis.
        return b_ref[:, k:k + 1]

    def lin(w, h, b):
        return jnp.dot(w, h, preferred_element_type=jnp.float32) + b

    h = x_ref[...].astype(jnp.float32)                 # [2, T]

    h = swish(lin(w1_ref[...], h, bias_col(0)))        # Linear(2,32)  + Swish
    h = swish(lin(wstack_ref[0], h, bias_col(1)))      # Linear(32,32) + Swish
    h = swish(lin(wstack_ref[1], h, bias_col(2)))      # Linear(32,32) + Swish

    # ResidualBlock(32, Swish): out = swish(linear2(swish(linear1(h))) + h)
    identity = h
    r = swish(lin(wstack_ref[2], h, bias_col(3)))
    r = lin(wstack_ref[3], r, bias_col(4))
    h = swish(r + identity)

    h = swish(lin(wstack_ref[4], h, bias_col(5)))      # Linear(32,32) + Swish

    # Final Linear(32,1), no activation; lane-dense [1, T] store.
    o_ref[...] = lin(w5_ref[...], h, b_ref[0:1, 6:7]).astype(o_ref.dtype)


# ----------------------------------------------------------------------------
# Parameter packing: params is a list of (W [in,out], b [1,out]) pairs in the
# order (L1, L2, L3, Res.linear1, Res.linear2, L4, L5).
# ----------------------------------------------------------------------------
def _pack_params(params):
    (w1, b1), (w2, b2), (w3, b3), (rw1, rb1), (rw2, rb2), (w4, b4), (w5, b5) = params
    w1t = jnp.asarray(w1, jnp.float32).T                                   # [32, 2]
    wstack = jnp.stack([jnp.asarray(w, jnp.float32).T
                        for w in (w2, w3, rw1, rw2, w4)])                  # [5, 32, 32]
    w5t = jnp.asarray(w5, jnp.float32).T                                   # [1, 32]

    cols = [jnp.reshape(jnp.asarray(b, jnp.float32), (-1,))
            for b in (b1, b2, b3, rb1, rb2, b4)]                           # each [32]
    b5col = jnp.zeros((32,), jnp.float32).at[0].set(
        jnp.reshape(jnp.asarray(b5, jnp.float32), ()))                     # b5 at row 0
    pad = jnp.zeros((32,), jnp.float32)
    bstack = jnp.stack(cols + [b5col, pad], axis=1)                        # [32, 8]
    return w1t, wstack, w5t, bstack


# ----------------------------------------------------------------------------
# Wrapper
# ----------------------------------------------------------------------------
def pinn_v2_forward(inputs, params, *, batch_tile=2048, approx_swish=True):
    """Forward pass of PINN_V2.

    inputs: [B, 2] array of (x, t) pairs, or a tuple (x, t) like the PyTorch
            module accepts.  Returns [B, 1] float32.
    params: list of (W [in,out], b [1,out]) pairs, see init_params().
    """
    if isinstance(inputs, tuple) and len(inputs) == 2:
        x, t = inputs
        x = x[:, None] if x.ndim == 1 else x
        t = t[:, None] if t.ndim == 1 else t
        xt = jnp.concatenate([x, t], axis=1)
    else:
        xt = inputs

    B, in_dim = xt.shape
    assert in_dim == 2

    w1t, wstack, w5t, bstack = _pack_params(params)

    # --- batch tiling: lane-aligned, padded, >=2 grid steps when possible ---
    bp_min = _round_up(B, _LANE)
    tile = min(_round_up(batch_tile, _LANE), bp_min)
    if bp_min // tile < 2 and tile > _LANE:
        # Keep at least 2 "parallel" grid steps so v7x can use both TensorCores.
        tile = _round_up(tile // 2, _LANE)
    bp = _round_up(bp_min, tile)
    grid = (bp // tile,)

    # Transpose so batch is the lane (last) axis, pad batch to the tiled size.
    x_t = jnp.pad(jnp.asarray(xt, jnp.float32).T, ((0, 0), (0, bp - B)))   # [2, bp]

    kernel = functools.partial(_pinn_v2_kernel, approx=approx_swish)

    out_t = pl.pallas_call(
        kernel,
        out_shape=jax.ShapeDtypeStruct((1, bp), jnp.float32),
        grid_spec=pltpu.PrefetchScalarGridSpec(
            num_scalar_prefetch=0,
            grid=grid,
            in_specs=[
                pl.BlockSpec((2, tile), lambda i: (0, i)),          # x^T tile
                pl.BlockSpec(w1t.shape, lambda i: (0, 0)),          # W1 (resident)
                pl.BlockSpec(wstack.shape, lambda i: (0, 0, 0)),    # packed 32x32 weights
                pl.BlockSpec(w5t.shape, lambda i: (0, 0)),          # W5
                pl.BlockSpec(bstack.shape, lambda i: (0, 0)),       # packed biases
            ],
            out_specs=pl.BlockSpec((1, tile), lambda i: (0, i)),    # lane-dense output
        ),
        compiler_params=pltpu.CompilerParams(
            dimension_semantics=("parallel",),
        ),
    )(x_t, w1t, wstack, w5t, bstack)

    return out_t[:, :B].T                                            # [B, 1]


# ----------------------------------------------------------------------------
# Deterministic parameter init (Xavier-normal weights), matching
# PINN_V2(layers=[2,32,32,32,32,1], activation='Swish').  PyTorch inits biases
# to 0; bias_std lets the test exercise the bias path with nonzero values.
# ----------------------------------------------------------------------------
def init_params(key, layers=(2, 32, 32, 32, 32, 1), bias_std=0.0):
    def make(key, fan_in, fan_out):
        wk, bk = jax.random.split(key)
        std = jnp.sqrt(2.0 / (fan_in + fan_out))
        w = jax.random.normal(wk, (fan_in, fan_out), dtype=jnp.float32) * std
        if bias_std > 0.0:
            b = jax.random.normal(bk, (1, fan_out), dtype=jnp.float32) * bias_std
        else:
            b = jnp.zeros((1, fan_out), dtype=jnp.float32)
        return w, b

    keys = jax.random.split(key, 7)
    params = []
    # Stem: Linear(2,32), Linear(32,32), Linear(32,32)
    params.append(make(keys[0], layers[0], layers[1]))
    params.append(make(keys[1], layers[1], layers[2]))
    params.append(make(keys[2], layers[2], layers[3]))
    # ResidualBlock(32): linear1, linear2 (inserted after i==2, layers[2]==layers[3])
    params.append(make(keys[3], layers[3], layers[3]))
    params.append(make(keys[4], layers[3], layers[3]))
    # Linear(32,32)
    params.append(make(keys[5], layers[3], layers[4]))
    # Final Linear(32,1)
    params.append(make(keys[6], layers[4], layers[5]))
    return params


# ----------------------------------------------------------------------------
# Pure-JAX reference
# ----------------------------------------------------------------------------
def reference_forward(xt, params):
    def swish(v):
        return v * jax.nn.sigmoid(v)

    (w1, b1), (w2, b2), (w3, b3), (rw1, rb1), (rw2, rb2), (w4, b4), (w5, b5) = params
    h = swish(xt @ w1 + b1)
    h = swish(h @ w2 + b2)
    h = swish(h @ w3 + b3)
    identity = h
    r = swish(h @ rw1 + rb1)
    r = r @ rw2 + rb2
    h = swish(r + identity)
    h = swish(h @ w4 + b4)
    return h @ w5 + b5


if __name__ == "__main__":
    key = jax.random.PRNGKey(0)
    pkey, xkey = jax.random.split(key)

    layers = (2, 32, 32, 32, 32, 1)
    # Nonzero biases so the packed-bias path is actually exercised by the check.
    params = init_params(pkey, layers, bias_std=0.1)

    # Deliberately not a multiple of 128: exercises batch padding + a 2-step grid.
    B = 300
    xt = jax.random.normal(xkey, (B, 2), dtype=jnp.float32)

    ref = reference_forward(xt, params)

    # 1) Exact-Swish path: tight correctness check against the pure-JAX reference.
    out_exact = jax.block_until_ready(
        pinn_v2_forward(xt, params, approx_swish=False))
    assert out_exact.shape == (B, 1)
    assert jnp.allclose(out_exact, ref, atol=1e-4, rtol=1e-3), "exact-path mismatch"

    # 2) Fast path (EUP approximate reciprocal in Swish): loose sanity check only,
    #    since the approx reciprocal intentionally trades a little precision.
    out = jax.block_until_ready(pinn_v2_forward(xt, params))
    assert out.shape == (B, 1)
    assert bool(jnp.all(jnp.isfinite(out)))
    rel_l2 = jnp.linalg.norm(out - ref) / (jnp.linalg.norm(ref) + 1e-12)
    assert float(rel_l2) < 0.1, f"approx-path rel L2 too large: {float(rel_l2)}"

    print("KERNEL_OK")
</pallas_src>

<mosaic_0001>
module attributes {stable_mosaic.version = 11 : i64} {
  func.func @_pinn_v2_kernel(%arg0: i32, %arg1: memref<2x256xf32, #tpu.memory_space<vmem>>, %arg2: memref<32x2xf32, #tpu.memory_space<vmem>>, %arg3: memref<5x32x32xf32, #tpu.memory_space<vmem>>, %arg4: memref<1x32xf32, #tpu.memory_space<vmem>>, %arg5: memref<32x8xf32, #tpu.memory_space<vmem>>, %arg6: memref<1x256xf32, #tpu.memory_space<vmem>>) attributes {dimension_semantics = [#tpu.dimension_semantics<parallel>], iteration_bounds = array<i64: 2>, scalar_prefetch = 0 : i64, scratch_operands = 0 : i64, tpu.core_type = #tpu.core_type<tc>, window_params = [{transform_indices = @transform_0, window_bounds = array<i64: 2, 256>}, {pipeline_mode = #tpu.pipeline_mode<synchronous>, transform_indices = @transform_1, window_bounds = array<i64: 32, 2>}, {pipeline_mode = #tpu.pipeline_mode<synchronous>, transform_indices = @transform_2, window_bounds = array<i64: 5, 32, 32>}, {pipeline_mode = #tpu.pipeline_mode<synchronous>, transform_indices = @transform_3, window_bounds = array<i64: 1, 32>}, {pipeline_mode = #tpu.pipeline_mode<synchronous>, transform_indices = @transform_4, window_bounds = array<i64: 32, 8>}, {transform_indices = @transform_5, window_bounds = array<i64: 1, 256>}]} {
    %c0 = arith.constant 0 : index
    %c0_0 = arith.constant 0 : index
    %0 = vector.load %arg1[%c0, %c0_0] : memref<2x256xf32, #tpu.memory_space<vmem>>, vector<2x256xf32>
    %c0_1 = arith.constant 0 : index
    %c0_2 = arith.constant 0 : index
    %1 = vector.load %arg2[%c0_1, %c0_2] : memref<32x2xf32, #tpu.memory_space<vmem>>, vector<32x2xf32>
    %c0_3 = arith.constant 0 : index
    %c0_4 = arith.constant 0 : index
    %2 = vector.load %arg5[%c0_3, %c0_4] : memref<32x8xf32, #tpu.memory_space<vmem>>, vector<32x1xf32>
    %cst = arith.constant dense<0.000000e+00> : vector<32x256xf32>
    %3 = tpu.matmul %1, %0, %cst {dimension_numbers = #tpu.dot_dimension_numbers<[1], [0], [0], [1], [0, 0, 1, 1], [], []>} : vector<32x2xf32>, vector<2x256xf32>, vector<32x256xf32> -> vector<32x256xf32>
    %4 = vector.broadcast %2 : vector<32x1xf32> to vector<32x256xf32>
    %5 = arith.addf %3, %4 : vector<32x256xf32>
    %cst_5 = arith.constant 0.000000e+00 : f32
    %6 = vector.broadcast %cst_5 : f32 to vector<32x256xf32>
    %7 = arith.subf %6, %5 : vector<32x256xf32>
    %8 = math.exp %7 : vector<32x256xf32>
    %cst_6 = arith.constant 1.000000e+00 : f32
    %9 = vector.broadcast %cst_6 : f32 to vector<32x256xf32>
    %10 = arith.addf %9, %8 : vector<32x256xf32>
    %11 = tpu.reciprocal %10 : vector<32x256xf32> -> vector<32x256xf32>
    %12 = arith.mulf %5, %11 : vector<32x256xf32>
    %c0_7 = arith.constant 0 : index
    %c0_8 = arith.constant 0 : index
    %c0_9 = arith.constant 0 : index
    %13 = vector.load %arg3[%c0_7, %c0_8, %c0_9] : memref<5x32x32xf32, #tpu.memory_space<vmem>>, vector<1x32x32xf32>
    %14 = vector.shape_cast %13 : vector<1x32x32xf32> to vector<32x32xf32>
    %c0_10 = arith.constant 0 : index
    %c1 = arith.constant 1 : index
    %15 = vector.load %arg5[%c0_10, %c1] : memref<32x8xf32, #tpu.memory_space<vmem>>, vector<32x1xf32>
    %cst_11 = arith.constant dense<0.000000e+00> : vector<32x256xf32>
    %16 = tpu.matmul %14, %12, %cst_11 {dimension_numbers = #tpu.dot_dimension_numbers<[1], [0], [0], [1], [0, 0, 1, 1], [], []>} : vector<32x32xf32>, vector<32x256xf32>, vector<32x256xf32> -> vector<32x256xf32>
    %17 = vector.broadcast %15 : vector<32x1xf32> to vector<32x256xf32>
    %18 = arith.addf %16, %17 : vector<32x256xf32>
    %cst_12 = arith.constant 0.000000e+00 : f32
    %19 = vector.broadcast %cst_12 : f32 to vector<32x256xf32>
    %20 = arith.subf %19, %18 : vector<32x256xf32>
    %21 = math.exp %20 : vector<32x256xf32>
    %cst_13 = arith.constant 1.000000e+00 : f32
    %22 = vector.broadcast %cst_13 : f32 to vector<32x256xf32>
    %23 = arith.addf %22, %21 : vector<32x256xf32>
    %24 = tpu.reciprocal %23 : vector<32x256xf32> -> vector<32x256xf32>
    %25 = arith.mulf %18, %24 : vector<32x256xf32>
    %c1_14 = arith.constant 1 : index
    %c0_15 = arith.constant 0 : index
    %c0_16 = arith.constant 0 : index
    %26 = vector.load %arg3[%c1_14, %c0_15, %c0_16] : memref<5x32x32xf32, #tpu.memory_space<vmem>>, vector<1x32x32xf32>
    %27 = vector.shape_cast %26 : vector<1x32x32xf32> to vector<32x32xf32>
    %c0_17 = arith.constant 0 : index
    %c2 = arith.constant 2 : index
    %28 = vector.load %arg5[%c0_17, %c2] : memref<32x8xf32, #tpu.memory_space<vmem>>, vector<32x1xf32>
    %cst_18 = arith.constant dense<0.000000e+00> : vector<32x256xf32>
    %29 = tpu.matmul %27, %25, %cst_18 {dimension_numbers = #tpu.dot_dimension_numbers<[1], [0], [0], [1], [0, 0, 1, 1], [], []>} : vector<32x32xf32>, vector<32x256xf32>, vector<32x256xf32> -> vector<32x256xf32>
    %30 = vector.broadcast %28 : vector<32x1xf32> to vector<32x256xf32>
    %31 = arith.addf %29, %30 : vector<32x256xf32>
    %cst_19 = arith.constant 0.000000e+00 : f32
    %32 = vector.broadcast %cst_19 : f32 to vector<32x256xf32>
    %33 = arith.subf %32, %31 : vector<32x256xf32>
    %34 = math.exp %33 : vector<32x256xf32>
    %cst_20 = arith.constant 1.000000e+00 : f32
    %35 = vector.broadcast %cst_20 : f32 to vector<32x256xf32>
    %36 = arith.addf %35, %34 : vector<32x256xf32>
    %37 = tpu.reciprocal %36 : vector<32x256xf32> -> vector<32x256xf32>
    %38 = arith.mulf %31, %37 : vector<32x256xf32>
    %c2_21 = arith.constant 2 : index
    %c0_22 = arith.constant 0 : index
    %c0_23 = arith.constant 0 : index
    %39 = vector.load %arg3[%c2_21, %c0_22, %c0_23] : memref<5x32x32xf32, #tpu.memory_space<vmem>>, vector<1x32x32xf32>
    %40 = vector.shape_cast %39 : vector<1x32x32xf32> to vector<32x32xf32>
    %c0_24 = arith.constant 0 : index
    %c3 = arith.constant 3 : index
    %41 = vector.load %arg5[%c0_24, %c3] : memref<32x8xf32, #tpu.memory_space<vmem>>, vector<32x1xf32>
    %cst_25 = arith.constant dense<0.000000e+00> : vector<32x256xf32>
    %42 = tpu.matmul %40, %38, %cst_25 {dimension_numbers = #tpu.dot_dimension_numbers<[1], [0], [0], [1], [0, 0, 1, 1], [], []>} : vector<32x32xf32>, vector<32x256xf32>, vector<32x256xf32> -> vector<32x256xf32>
    %43 = vector.broadcast %41 : vector<32x1xf32> to vector<32x256xf32>
    %44 = arith.addf %42, %43 : vector<32x256xf32>
    %cst_26 = arith.constant 0.000000e+00 : f32
    %45 = vector.broadcast %cst_26 : f32 to vector<32x256xf32>
    %46 = arith.subf %45, %44 : vector<32x256xf32>
    %47 = math.exp %46 : vector<32x256xf32>
    %cst_27 = arith.constant 1.000000e+00 : f32
    %48 = vector.broadcast %cst_27 : f32 to vector<32x256xf32>
    %49 = arith.addf %48, %47 : vector<32x256xf32>
    %50 = tpu.reciprocal %49 : vector<32x256xf32> -> vector<32x256xf32>
    %51 = arith.mulf %44, %50 : vector<32x256xf32>
    %c3_28 = arith.constant 3 : index
    %c0_29 = arith.constant 0 : index
    %c0_30 = arith.constant 0 : index
    %52 = vector.load %arg3[%c3_28, %c0_29, %c0_30] : memref<5x32x32xf32, #tpu.memory_space<vmem>>, vector<1x32x32xf32>
    %53 = vector.shape_cast %52 : vector<1x32x32xf32> to vector<32x32xf32>
    %c0_31 = arith.constant 0 : index
    %c4 = arith.constant 4 : index
    %54 = vector.load %arg5[%c0_31, %c4] : memref<32x8xf32, #tpu.memory_space<vmem>>, vector<32x1xf32>
    %cst_32 = arith.constant dense<0.000000e+00> : vector<32x256xf32>
    %55 = tpu.matmul %53, %51, %cst_32 {dimension_numbers = #tpu.dot_dimension_numbers<[1], [0], [0], [1], [0, 0, 1, 1], [], []>} : vector<32x32xf32>, vector<32x256xf32>, vector<32x256xf32> -> vector<32x256xf32>
    %56 = vector.broadcast %54 : vector<32x1xf32> to vector<32x256xf32>
    %57 = arith.addf %55, %56 : vector<32x256xf32>
    %58 = arith.addf %57, %38 : vector<32x256xf32>
    %cst_33 = arith.constant 0.000000e+00 : f32
    %59 = vector.broadcast %cst_33 : f32 to vector<32x256xf32>
    %60 = arith.subf %59, %58 : vector<32x256xf32>
    %61 = math.exp %60 : vector<32x256xf32>
    %cst_34 = arith.constant 1.000000e+00 : f32
    %62 = vector.broadcast %cst_34 : f32 to vector<32x256xf32>
    %63 = arith.addf %62, %61 : vector<32x256xf32>
    %64 = tpu.reciprocal %63 : vector<32x256xf32> -> vector<32x256xf32>
    %65 = arith.mulf %58, %64 : vector<32x256xf32>
    %c4_35 = arith.constant 4 : index
    %c0_36 = arith.constant 0 : index
    %c0_37 = arith.constant 0 : index
    %66 = vector.load %arg3[%c4_35, %c0_36, %c0_37] : memref<5x32x32xf32, #tpu.memory_space<vmem>>, vector<1x32x32xf32>
    %67 = vector.shape_cast %66 : vector<1x32x32xf32> to vector<32x32xf32>
    %c0_38 = arith.constant 0 : index
    %c5 = arith.constant 5 : index
    %68 = vector.load %arg5[%c0_38, %c5] : memref<32x8xf32, #tpu.memory_space<vmem>>, vector<32x1xf32>
    %cst_39 = arith.constant dense<0.000000e+00> : vector<32x256xf32>
    %69 = tpu.matmul %67, %65, %cst_39 {dimension_numbers = #tpu.dot_dimension_numbers<[1], [0], [0], [1], [0, 0, 1, 1], [], []>} : vector<32x32xf32>, vector<32x256xf32>, vector<32x256xf32> -> vector<32x256xf32>
    %70 = vector.broadcast %68 : vector<32x1xf32> to vector<32x256xf32>
    %71 = arith.addf %69, %70 : vector<32x256xf32>
    %cst_40 = arith.constant 0.000000e+00 : f32
    %72 = vector.broadcast %cst_40 : f32 to vector<32x256xf32>
    %73 = arith.subf %72, %71 : vector<32x256xf32>
    %74 = math.exp %73 : vector<32x256xf32>
    %cst_41 = arith.constant 1.000000e+00 : f32
    %75 = vector.broadcast %cst_41 : f32 to vector<32x256xf32>
    %76 = arith.addf %75, %74 : vector<32x256xf32>
    %77 = tpu.reciprocal %76 : vector<32x256xf32> -> vector<32x256xf32>
    %78 = arith.mulf %71, %77 : vector<32x256xf32>
    %c0_42 = arith.constant 0 : index
    %c0_43 = arith.constant 0 : index
    %79 = vector.load %arg4[%c0_42, %c0_43] : memref<1x32xf32, #tpu.memory_space<vmem>>, vector<1x32xf32>
    %c0_44 = arith.constant 0 : index
    %c6 = arith.constant 6 : index
    %80 = vector.load %arg5[%c0_44, %c6] : memref<32x8xf32, #tpu.memory_space<vmem>>, vector<1x1xf32>
    %cst_45 = arith.constant dense<0.000000e+00> : vector<1x256xf32>
    %81 = tpu.matmul %79, %78, %cst_45 {dimension_numbers = #tpu.dot_dimension_numbers<[1], [0], [0], [1], [0, 0, 1, 1], [], []>} : vector<1x32xf32>, vector<32x256xf32>, vector<1x256xf32> -> vector<1x256xf32>
    %82 = vector.broadcast %80 : vector<1x1xf32> to vector<1x256xf32>
    %83 = arith.addf %81, %82 : vector<1x256xf32>
    %c0_46 = arith.constant 0 : index
    %c0_47 = arith.constant 0 : index
    %84 = vector.load %arg6[%c0_46, %c0_47] : memref<1x256xf32, #tpu.memory_space<vmem>>, vector<1x256xf32>
    tpu.vector_store %arg6[%c0_46, %c0_47], %83 {strides = array<i32>} : memref<1x256xf32, #tpu.memory_space<vmem>>, vector<1x256xf32>,
    return
  }
  func.func @transform_0(%arg0: i32) -> (i32, i32) {
    %c0_i32 = arith.constant 0 : i32
    %c0_i32_0 = arith.constant 0 : i32
    return %c0_i32, %arg0 : i32, i32
  }
  func.func @transform_1(%arg0: i32) -> (i32, i32) {
    %c0_i32 = arith.constant 0 : i32
    %c0_i32_0 = arith.constant 0 : i32
    %c0_i32_1 = arith.constant 0 : i32
    return %c0_i32, %c0_i32_0 : i32, i32
  }
  func.func @transform_2(%arg0: i32) -> (i32, i32, i32) {
    %c0_i32 = arith.constant 0 : i32
    %c0_i32_0 = arith.constant 0 : i32
    %c0_i32_1 = arith.constant 0 : i32
    %c0_i32_2 = arith.constant 0 : i32
    return %c0_i32, %c0_i32_0, %c0_i32_1 : i32, i32, i32
  }
  func.func @transform_3(%arg0: i32) -> (i32, i32) {
    %c0_i32 = arith.constant 0 : i32
    %c0_i32_0 = arith.constant 0 : i32
    %c0_i32_1 = arith.constant 0 : i32
    return %c0_i32, %c0_i32_0 : i32, i32
  }
  func.func @transform_4(%arg0: i32) -> (i32, i32) {
    %c0_i32 = arith.constant 0 : i32
    %c0_i32_0 = arith.constant 0 : i32
    %c0_i32_1 = arith.constant 0 : i32
    return %c0_i32, %c0_i32_0 : i32, i32
  }
  func.func @transform_5(%arg0: i32) -> (i32, i32) {
    %c0_i32 = arith.constant 0 : i32
    %c0_i32_0 = arith.constant 0 : i32
    return %c0_i32, %arg0 : i32, i32
  }
}

</mosaic_0001>

<bundles_post_ra>
// kernel: tpu_custom_call.1
= control target key start
LH: loop header
LB: loop body
LE: loop exit
PB: predicated region body
PF: predicated region fallthrough
CT: control target
= control target key end

     0   :  { %10 = vsyncpa [#allocation3], 0  ;;  %s2349_s0 = inlined_call_operand.vmem [shape: f32[2,512], index: 0, kind: input, shape index: {}]   ;;  %s2350_s1 = inlined_call_operand.vmem [shape: f32[32,2], index: 1, kind: input, shape index: {}]   ;;  %s2351_s2 = inlined_call_operand.hbm [shape: f32[5,32,32], index: 2, kind: input, shape index: {}]   ;;  %s2352_s3 = inlined_call_operand.vmem [shape: f32[1,32], index: 3, kind: input, shape index: {}]   ;;  %s2353_s4 = inlined_call_operand.vmem [shape: f32[32,8], index: 4, kind: input, shape index: {}]   ;;  %s2354_s5 = inlined_call_operand.hbm [shape: f32[1,512], index: 5, kind: output, shape index: {}]  }
   0x1   :  { %11 = vsyncpa [#allocation4], 0 }
   0x2   :  { %13 = vsyncpa [#allocation4 + $0x1], 0  ;;  %s1987_s18 = smov 0   ;;  %s1989_s19 = smov 0  }
   0x3   :  { %s1991_s20 = smov 0   ;;  %s1993_s21 = smov 0  }
   0x4 LB: > { %s2008_s22 = sadd.s32 4294967295, %s1942_s21   ;;  %s1490_s23 = sadd.s32 4294967294, %s1942_s21   ;;  %s1942_s21 = sphi %s1993_s21, %s2370_s21   ;;  %s1938_s20 = sphi %s1991_s20, %s2369_s20   ;;  %s1934_s19 = sphi %s1989_s19, %s2368_s19   ;;  %s1930_s18 = sphi %s1987_s18, %s2367_s18  }
   0x5   : > { %s2012_s24 = sadd.s32 1, %s1942_s21   ;;  %s136_s25 = sadd.s32 1, %s1938_s20 }
   0x6   : > { %s133_s26 = ssub.s32 %s1942_s21, %s2012_s24  ;;  %p146_p0 = scmp.ne.s32.totalorder %s1938_s20, %s1934_s19 }
   0x7   : > { %p134_p1 = scmp.eq.s32.totalorder %s133_s26, 0  ;;  %p147_p2 = scmp.eq.s32.totalorder %s2008_s22, 1 }
   0x8   : > { %p152_p3 = scmp.ne.s32.totalorder %s1934_s19, %s1930_s18  ;;  %p153_p4 = scmp.eq.s32.totalorder %s1490_s23, 1 }
   0x9   : > { %s2023_s27 = scalar_select %p134_p1, %s1938_s20, %s136_s25  }
   0xa   : > { %p2025_p5 = por %p147_p2, %p146_p0  ;;  %p2029_p6 = por %p153_p4, %p152_p3 }
   0xb   : > { %p1491_p7 = scmp.ge.s32.totalorder %s1942_s21, 1  ;;  %p160_p8 = scmp.lt.s32.totalorder %s1942_s21, 3 }
   0xc   : > { %s2358_s28 = scalar_select %p2025_p5, 1, 0 }
   0xd   : > { %s2359_s29 = scalar_select %p2029_p6, 1, 0 }
   0xe   : > { %p2355_p9 = scmp.eq.s32.totalorder %s2008_s22, 0  ;;  %p2036_p10 = pnand %p1491_p7, %p160_p8 }
   0xf   : > { %s1944_s6 = smov [#allocation2]   ;;  %s1848_s11 = scalar_lea.hbm %s2351_s2, 2560 }
  0x10   : > { %s2360_s30 = scalar_select %p2036_p10, 1, 0 }
  0x11   : > { %s175_s7 = sshll.u32 %s1944_s6, 4  ;;  %p1587_p11 = pneg %p2036_p10  ;;  %s176_s7 = int_to_ptr.vmem [resolvable:$true] %s175_s7 }
  0x12   : > { %p1849_p13 = scmp.ne.s32.totalorder %s2351_s2, %s1848_s11  ;;  %p1855_p3 = scmp.lt.u32.totalorder %s1848_s11, %s2351_s2 }
  0x13   : > { %p2044_p12 = pnand %p2355_p9, %p1587_p11 }
  0x15   : > { %p1850_p0 = pneg %p2044_p12 }
  0x17   : > { %p1851_p1 = pnand %p1850_p0, %p1849_p13 }
  0x19   : > { %p1852_p2 = pneg %p1851_p1 }
  0x1b   : > { %p1857_p4 = pnand %p1855_p3, %p1852_p2 }
  0x1d   : > { %1860 = shalt.err (!%p1857_p4)
}
  0x1e   : > { %s1861_s16 = scalar_lea.vmem %s176_s7, 2560  ;;  %p1869_p9 = scmp.lt.s32.totalorder %s176_s7, %s176_s7 }
  0x1f   : > { %p1862_p7 = scmp.ne.s32.totalorder %s176_s7, %s1861_s16  ;;  %p1870_p6 = scmp.lt.s32.totalorder %s1861_s16, %s1861_s16 }
  0x21   : > { %p1864_p8 = pnand %p1862_p7, %p1850_p0  ;;  %p1871_p5 = por %p1870_p6, %p1869_p9 }
  0x23   : > { %p1865_p11 = pneg %p1864_p8 }
  0x25   : > { %p1872_p10 = pnand %p1871_p5, %p1865_p11 }
  0x27   : > { %1875 = shalt.err (!%p1872_p10)
}
  0x28   : > { %s1945_s17 = smov 128   ;;  %s1946_s23 = smov 8  }
  0x29   : > { %1590 = dma.hbm_to_vmem [thread:$0]  (!%p2044_p12), %s2351_s2, 2560, %s176_s7, [#allocation3], %s1945_s17, %s1945_s17, %s1946_s23  }
  0x2a   : > { %p2362_p13 = scmp.ne.s32.totalorder %s2360_s30, 0 }
  0x2b   : > { %p2363_p1 = scmp.eq.s32.totalorder (!%p2362_p13), %s2008_s22, 0 }
  0x2c   : > { %206 = sbr.rel (%p2362_p13) target bundleno = 1885 (0x75d), region = 40 }
  0x33   : > { %1921 = dma.done.wait (%p2363_p1), [#allocation3], 2560   ;;  %p2364_p0 = pmov %p2363_p1 }
  0x34   : > { %s1497_s6 = sshll.u32 %s2008_s22, 1  ;;  %v1947_v0 = vmov 0.0   ;;  %v1948_v1 = vmov 0   ;;  %vm292_vm0 = vcmask 1041408   ;;  %v2079_v4 = vld [vmem:[%s2353_s4] sm:$0xff]  ;;  %vm279_vm1 = vcmask 15360  }
  0x35   : > { %1923 = vsyncadd (%p2364_p0), [#allocation3], 4294964736  ;;  %p235_p5 = scmp.lt.s32.totalorder %s1497_s6, 3  ;;  %361 = vmatprep.mubr.f32.mxu0 %v1947_v0  ;;  %539 = vmatprep.mubr.f32.mxu1 %v1947_v0  ;;  %v242_v5 = vld [vmem:[%s2350_s1] sm:$0xff]  ;;  %v2088_v6 = vld [vmem:[%s2353_s4 + $0x10] sm:$0xff]  ;;  %v1949_v12 = vmov 1  }
  0x36   : > { %1642 = vset.pattern.permute.xlu0 %v1948_v1  ;;  %1643 = vset.pattern.permute.xlu1 %v1948_v1  ;;  %v2093_v7 = vld [vmem:[%s2353_s4 + $0x8] sm:$0xff]  ;;  %v2099_v8 = vld [vmem:[%s2353_s4 + $0x18] sm:$0xff]  ;;  %v244_v10 = vld [vmem:[%s2350_s1 + $0x10] sm:$0xff]  ;;  %vm462_vm2 = vcmask 261120   ;;  %s231_s14 = sand.u32 1, %s1934_s19   ;;  %s1532_s16 = sshll.u32 %s2008_s22, 5 }
  0x37   : > { %s2372_s6 = smov (!%p235_p5, %s1497_s6), 3  ;;  %252 = vperm.xlu0 %1642, %v2079_v4   ;;  %262 = vperm.xlu1 %1643, %v2088_v6   ;;  %v243_v9 = vld [vmem:[%s2350_s1 + $0x8] sm:$0xff]  ;;  %v245_v11 = vld [vmem:[%s2350_s1 + $0x18] sm:$0xff]  ;;  %s1496_s15 = sshll.u32 %s231_s14, 1 }
  0x38   : > { %s1498_s30 = sshll.u32 %s2372_s6, 1  ;;  %s233_s17 = scalar_lea.vmem [#allocation5], %s1496_s15 }
  0x39   : > { %s238_s9 = scalar_lea.vmem %s2349_s0, %s1498_s30  ;;  %s1419_s23 = sshll.u32 %s233_s17, 4  ;;  %s2309_s23 = int_to_ptr.vmem [resolvable:$true] %s1419_s23 }
  0x3a   : > { %v1499_v2 = vld.sshfl [vmem:[%s238_s9] sm:$0x33 pattern:$0x76325410]  ;;  %s2307_s6 = scalar_lea.hbm %s2354_s5, %s1532_s16  ;;  %s1405_s30 = scalar_lea.sflag [#allocation4], %s231_s14 }
  0x3b   : > { %v278_v3 = vcombine.high %v1499_v2, %v1499_v2  ;;  %257 = vperm.xlu0 %1642, %v2093_v7   ;;  %267 = vperm.xlu1 %1643, %v2099_v8   ;;  %s1876_s7 = scalar_lea.vmem %s2309_s23, 32  ;;  %p2365_p9 = scmp.ne.s32.totalorder %s2358_s28, 0 }
  0x3c   : > { %p1877_p6 = scmp.ne.s32.totalorder %s2309_s23, %s1876_s7  ;;  %s1956_s22 = smov [#allocation5]  }
  0x3d   : > { %1500 = vmatprep.subr.msk.mxu0 %vm292_vm0, %v278_v3  ;;  %s1880_s8 = sshll.u32 %s1956_s22, 4  ;;  %s1881_s8 = int_to_ptr.vmem [resolvable:$false] %s1880_s8 }
  0x3e   : > { %1501 = vmatpush1.msk.msra.mxu0 %vm292_vm0, %v1499_v2  ;;  %p1878_p10 = pnand %p1877_p6, %p2365_p9  ;;  %s1882_s9 = scalar_lea.vmem %s1881_s8, 64 }
  0x3f   : > { %1502 = vmatmul.mubr.msk.f32.vlgmr.msra.gmra.mrb[0].mxu0 %vm279_vm1, %v242_v5  ;;  %1644 = vset.pattern.permute.xlu0 %v1949_v12  ;;  %p1883_p2 = scmp.lt.s32.totalorder %s2309_s23, %s1881_s8  ;;  %p1884_p3 = scmp.lt.s32.totalorder %s1882_s9, %s1876_s7 }
  0x40   : > { %367 = vmatprep.mubr.f32.mxu0 %v1947_v0  ;;  %1645 = vset.pattern.permute.xlu1 %v1949_v12  ;;  %p1879_p12 = pneg %p1878_p10 }
  0x41   : > { %444 = vperm.xlu0 %1644, %v2079_v4   ;;  %449 = vperm.xlu1 %1645, %v2093_v7   ;;  %p1885_p4 = por %p1884_p3, %p1883_p2 }
  0x43   : > { %1503 = vmatmul.mubr.msk.f32.gmra.mrb[2].mxu0 %vm279_vm1, %v243_v9  ;;  %p1886_p7 = pnand %p1885_p4, %p1879_p12 }
  0x44   : > { %373 = vmatprep.mubr.f32.mxu0 %v1947_v0 }
  0x45   : > { %454 = vperm.xlu1 %1645, %v2088_v6   ;;  %459 = vperm.xlu0 %1644, %v2099_v8  }
  0x47   : > { %1504 = vmatmul.mubr.msk.f32.gmra.mrb[4].mxu0 %vm279_vm1, %v244_v10 }
  0x48   : > { %379 = vmatprep.mubr.f32.mxu0 %v1947_v0 }
  0x4b   : > { %1505 = vmatmul.mubr.msk.f32.gmra.mrb[6].mxu0 %vm279_vm1, %v245_v11 }
  0x4c   : > { %709 = vmatprep.mubr.f32.mxu0 %v1947_v0 }
  0xb6   : > { %v253_v13 = vpop.permute.xlu0 %252  ;;  %v263_v26 = vpop.permute.xlu1 %262 }
  0xba   : > { %v258_v18 = vpop.permute.xlu0 %257  ;;  %v268_v37 = vpop.permute.xlu1 %267 }
 0x112   : > { %v363_v14 = vpop.f32.mrb[0].mxu0 }
 0x113   : > { %v2124_v15 = vadd.f32 %v363_v14, %v253_v13  ;;  %v365_v16 = vpop.f32.mrb[1].mxu0 }
 0x114   : > { %v2126_v17 = vadd.f32 %v365_v16, %v253_v13 }
 0x115   : > { %v386_v19 = vsub.f32 0.0, %v2124_v15 }
 0x116   : > { %v387_v20 = vsub.f32 0.0, %v2126_v17  ;;  %v369_v21 = vpop.f32.mrb[2].mxu0 }
 0x117   : > { %v394_v22 = vmul.f32 1.442695, %v386_v19  ;;  %v370_v23 = vadd.f32 %v369_v21, %v258_v18  ;;  %v371_v24 = vpop.f32.mrb[3].mxu0 }
 0x118   : > { %v396_v25 = vmul.f32 1.442695, %v387_v20  ;;  %v372_v27 = vadd.f32 %v371_v24, %v258_v18 }
 0x119   : > { %1656 = vpow2.f32 %v394_v22  ;;  %v388_v28 = vsub.f32 0.0, %v370_v23 }
 0x11a   : > { %1658 = vpow2.f32 %v396_v25  ;;  %v389_v29 = vsub.f32 0.0, %v372_v27  ;;  %v375_v30 = vpop.f32.mrb[4].mxu0 }
 0x11b   : > { %v398_v31 = vmul.f32 1.442695, %v388_v28  ;;  %v376_v32 = vadd.f32 %v375_v30, %v263_v26  ;;  %v377_v33 = vpop.f32.mrb[5].mxu0  ;;  %v1950_v30 = vmov 2  }
 0x11c   : > { %v400_v34 = vmul.f32 1.442695, %v389_v29  ;;  %v2130_v35 = vadd.f32 %v377_v33, %v263_v26  ;;  %v437_v29 = vld [vmem:[#allocation2 + $0x18] sm:$0xff]  ;;  %1646 = vset.pattern.permute.xlu1 %v1950_v30  ;;  %1647 = vset.pattern.permute.xlu0 %v1950_v30  ;;  %v450_v33 = vpop.permute.xlu1 %449 }
 0x11d   : > { %1660 = vpow2.f32 %v398_v31  ;;  %v390_v36 = vsub.f32 0.0, %v376_v32  ;;  %618 = vperm.xlu1 %1646, %v2079_v4   ;;  %622 = vperm.xlu0 %1647, %v2093_v7   ;;  %v445_v31 = vpop.permute.xlu0 %444 }
 0x11e   : > { %1662 = vpow2.f32 %v400_v34  ;;  %v391_v38 = vsub.f32 0.0, %v2130_v35  ;;  %v381_v39 = vpop.f32.mrb[6].mxu0 }
 0x11f   : > { %v402_v40 = vmul.f32 1.442695, %v390_v36  ;;  %v382_v41 = vadd.f32 %v381_v39, %v268_v37  ;;  %v383_v42 = vpop.f32.mrb[7].mxu0 }
 0x120   : > { %v404_v43 = vmul.f32 1.442695, %v391_v38  ;;  %v384_v44 = vadd.f32 %v383_v42, %v268_v37 }
 0x121   : > { %1664 = vpow2.f32 %v402_v40  ;;  %v392_v45 = vsub.f32 0.0, %v382_v41  ;;  %626 = vperm.xlu1 %1646, %v2088_v6  }
 0x122   : > { %1666 = vpow2.f32 %v404_v43  ;;  %v393_v46 = vsub.f32 0.0, %v384_v44 }
 0x123   : > { %v1657_v47 = vpop.eup %1656  ;;  %v406_v48 = vmul.f32 1.442695, %v392_v45 }
 0x124   : > { %v1659_v49 = vpop.eup %1658  ;;  %v410_v50 = vadd.f32 1.0, %v1657_v47  ;;  %v408_v51 = vmul.f32 1.442695, %v393_v46 }
 0x125   : > { %v411_v52 = vadd.f32 1.0, %v1659_v49  ;;  %1668 = vpow2.f32 %v406_v48  ;;  %630 = vperm.xlu1 %1646, %v2099_v8  }
 0x126   : > { %1670 = vrcp.f32 %v410_v50 }
 0x127   : > { %v1661_v53 = vpop.eup %1660  ;;  %1672 = vpow2.f32 %v408_v51 }
 0x128   : > { %v1663_v54 = vpop.eup %1662  ;;  %v412_v55 = vadd.f32 1.0, %v1661_v53  ;;  %1674 = vrcp.f32 %v411_v52 }
 0x129   : > { %v413_v56 = vadd.f32 1.0, %v1663_v54 }
 0x12a   : > { %1676 = vrcp.f32 %v412_v55  ;;  %v460_v55 = vpop.permute.xlu0 %459 }
 0x12b   : > { %v1665_v57 = vpop.eup %1664  ;;  %1678 = vrcp.f32 %v413_v56 }
 0x12c   : > { %v1667_v58 = vpop.eup %1666  ;;  %v414_v59 = vadd.f32 1.0, %v1665_v57 }
 0x12d   : > { %v415_v61 = vadd.f32 1.0, %v1667_v58 }
 0x12e   : > { %1680 = vrcp.f32 %v414_v59 }
 0x12f   : > { %v1669_v60 = vpop.eup %1668 }
 0x130   : > { %v416_v62 = vadd.f32 1.0, %v1669_v60  ;;  %v1671_v63 = vpop.eup %1670 }
 0x131   : > { %v1673_v1 = vpop.eup %1672  ;;  %v426_v10 = vmul.f32 %v1671_v63, %v2124_v15 }
 0x132   : > { %1682 = vrcp.f32 %v416_v62  ;;  %v1675_v2 = vpop.eup %1674  ;;  %v417_v3 = vadd.f32 1.0, %v1673_v1 }
 0x133   : > { %1684 = vrcp.f32 %v415_v61  ;;  %v427_v12 = vmul.f32 %v1675_v2, %v2126_v17  ;;  %v435_v17 = vld [vmem:[#allocation2 + $0x8] sm:$0xff] }
 0x134   : > { %v1677_v5 = vpop.eup %1676  ;;  %1686 = vrcp.f32 %v417_v3 }
 0x135   : > { %v1679_v9 = vpop.eup %1678  ;;  %v428_v11 = vmul.f32 %v1677_v5, %v370_v23  ;;  %v434_v23 = vld [vmem:[#allocation2] sm:$0xff] }
 0x136   : > { %v429_v13 = vmul.f32 %v1679_v9, %v372_v27  ;;  %v436_v27 = vld [vmem:[#allocation2 + $0x10] sm:$0xff] }
 0x137   : > { %v1535_v14 = vpack.c.bf16 %v428_v11, %v426_v10 }
 0x138   : > { %v1533_v16 = vpack.c.bf16 %v429_v13, %v427_v12  ;;  %v1681_v18 = vpop.eup %1680 }
 0x139   : > { %v430_v21 = vmul.f32 %v1681_v18, %v376_v32 }
 0x13a   : > { %1534 = vmatprep.subr.bf16.mxu1 %v1533_v16 }
 0x13b   : > { %1536 = vmatpush1.bf16.msra.mxu1 %v1535_v14 }
 0x13c   : > { %v1683_v19 = vpop.eup %1682 }
 0x13d   : > { %v1685_v20 = vpop.eup %1684  ;;  %v432_v22 = vmul.f32 %v1683_v19, %v382_v41 }
 0x13e   : > { %v1687_v24 = vpop.eup %1686  ;;  %v431_v26 = vmul.f32 %v1685_v20, %v2130_v35 }
 0x13f   : > { %v1539_v25 = vpack.c.bf16 %v432_v22, %v430_v21  ;;  %v433_v28 = vmul.f32 %v1687_v24, %v384_v44  ;;  %v455_v44 = vpop.permute.xlu1 %454 }
 0x141   : > { %v1537_v15 = vpack.c.bf16 %v433_v28, %v431_v26 }
 0x143   : > { %1538 = vmatprep.subr.bf16.mxu1 %v1537_v15 }
 0x144   : > { %1540 = vmatpush1.bf16.msra.mxu1 %v1539_v25 }
 0x147   : > { %1506 = vmatmul.mubr.msk.f32.vlgmr.msra.gmra.mrb[0].mxu1 %vm462_vm2, %v434_v23 }
 0x148   : > { %545 = vmatprep.mubr.f32.mxu1 %v1947_v0 }
 0x14b   : > { %1507 = vmatmul.mubr.msk.f32.gmra.mrb[2].mxu1 %vm462_vm2, %v435_v17 }
 0x14c   : > { %551 = vmatprep.mubr.f32.mxu1 %v1947_v0 }
 0x14f   : > { %1508 = vmatmul.mubr.msk.f32.gmra.mrb[4].mxu1 %vm462_vm2, %v436_v27 }
 0x150   : > { %557 = vmatprep.mubr.f32.mxu1 %v1947_v0 }
 0x153   : > { %1509 = vmatmul.mubr.msk.f32.gmra.mrb[6].mxu1 %vm462_vm2, %v437_v29 }
 0x154   : > { %879 = vmatprep.mubr.f32.mxu1 %v1947_v0 }
 0x21a   : > { %v541_v32 = vpop.f32.mrb[0].mxu1 }
 0x21b   : > { %v2148_v34 = vadd.f32 %v541_v32, %v445_v31  ;;  %v543_v35 = vpop.f32.mrb[1].mxu1 }
 0x21c   : > { %v2150_v36 = vadd.f32 %v543_v35, %v445_v31 }
 0x21d   : > { %v564_v37 = vsub.f32 0.0, %v2148_v34 }
 0x21e   : > { %v565_v38 = vsub.f32 0.0, %v2150_v36  ;;  %v547_v39 = vpop.f32.mrb[2].mxu1 }
 0x21f   : > { %v572_v40 = vmul.f32 1.442695, %v564_v37  ;;  %v548_v41 = vadd.f32 %v547_v39, %v450_v33  ;;  %v549_v42 = vpop.f32.mrb[3].mxu1 }
 0x220   : > { %v574_v43 = vmul.f32 1.442695, %v565_v38  ;;  %v550_v45 = vadd.f32 %v549_v42, %v450_v33 }
 0x221   : > { %1688 = vpow2.f32 %v572_v40  ;;  %v566_v46 = vsub.f32 0.0, %v548_v41 }
 0x222   : > { %1690 = vpow2.f32 %v574_v43  ;;  %v567_v47 = vsub.f32 0.0, %v550_v45  ;;  %v553_v48 = vpop.f32.mrb[4].mxu1 }
 0x223   : > { %v576_v49 = vmul.f32 1.442695, %v566_v46  ;;  %v554_v50 = vadd.f32 %v553_v48, %v455_v44  ;;  %v555_v51 = vpop.f32.mrb[5].mxu1  ;;  %v1951_v48 = vmov 3  }
 0x224   : > { %v578_v52 = vmul.f32 1.442695, %v567_v47  ;;  %v2154_v53 = vadd.f32 %v555_v51, %v455_v44  ;;  %v616_v47 = vld [vmem:[#allocation2 + $0x38] sm:$0xff]  ;;  %1648 = vset.pattern.permute.xlu0 %v1951_v48  ;;  %1649 = vset.pattern.permute.xlu1 %v1951_v48 }
 0x225   : > { %1692 = vpow2.f32 %v576_v49  ;;  %v568_v54 = vsub.f32 0.0, %v554_v50  ;;  %788 = vperm.xlu0 %1648, %v2079_v4   ;;  %792 = vperm.xlu1 %1649, %v2093_v7   ;;  %v619_v49 = vpop.permute.xlu1 %618 }
 0x226   : > { %1694 = vpow2.f32 %v578_v52  ;;  %v569_v56 = vsub.f32 0.0, %v2154_v53  ;;  %v559_v57 = vpop.f32.mrb[6].mxu1 }
 0x227   : > { %v580_v58 = vmul.f32 1.442695, %v568_v54  ;;  %v560_v59 = vadd.f32 %v559_v57, %v460_v55  ;;  %v561_v60 = vpop.f32.mrb[7].mxu1  ;;  %v623_v54 = vpop.permute.xlu0 %622 }
 0x228   : > { %v582_v61 = vmul.f32 1.442695, %v569_v56  ;;  %v562_v62 = vadd.f32 %v561_v60, %v460_v55 }
 0x229   : > { %1696 = vpow2.f32 %v580_v58  ;;  %v570_v63 = vsub.f32 0.0, %v560_v59  ;;  %796 = vperm.xlu1 %1649, %v2088_v6   ;;  %800 = vperm.xlu0 %1648, %v2099_v8  }
 0x22a   : > { %1698 = vpow2.f32 %v582_v61  ;;  %v571_v1 = vsub.f32 0.0, %v562_v62  ;;  %v627_v61 = vpop.permute.xlu1 %626 }
 0x22b   : > { %v1689_v2 = vpop.eup %1688  ;;  %v584_v3 = vmul.f32 1.442695, %v570_v63 }
 0x22c   : > { %v1691_v5 = vpop.eup %1690  ;;  %v588_v9 = vadd.f32 1.0, %v1689_v2  ;;  %v586_v10 = vmul.f32 1.442695, %v571_v1 }
 0x22d   : > { %v589_v11 = vadd.f32 1.0, %v1691_v5  ;;  %1700 = vpow2.f32 %v584_v3 }
 0x22e   : > { %1702 = vrcp.f32 %v588_v9 }
 0x22f   : > { %v1693_v12 = vpop.eup %1692  ;;  %1704 = vpow2.f32 %v586_v10 }
 0x230   : > { %v1695_v13 = vpop.eup %1694  ;;  %v590_v14 = vadd.f32 1.0, %v1693_v12  ;;  %1706 = vrcp.f32 %v589_v11 }
 0x231   : > { %v591_v16 = vadd.f32 1.0, %v1695_v13 }
 0x232   : > { %1708 = vrcp.f32 %v590_v14  ;;  %v631_v14 = vpop.permute.xlu1 %630 }
 0x233   : > { %v1697_v18 = vpop.eup %1696  ;;  %1710 = vrcp.f32 %v591_v16 }
 0x234   : > { %v1699_v19 = vpop.eup %1698  ;;  %v592_v20 = vadd.f32 1.0, %v1697_v18 }
 0x235   : > { %v593_v22 = vadd.f32 1.0, %v1699_v19 }
 0x236   : > { %1712 = vrcp.f32 %v592_v20 }
 0x237   : > { %v1701_v21 = vpop.eup %1700 }
 0x238   : > { %v594_v24 = vadd.f32 1.0, %v1701_v21  ;;  %v1703_v25 = vpop.eup %1702 }
 0x239   : > { %v1705_v26 = vpop.eup %1704  ;;  %v604_v27 = vmul.f32 %v1703_v25, %v2148_v34 }
 0x23a   : > { %1714 = vrcp.f32 %v594_v24  ;;  %v1707_v28 = vpop.eup %1706  ;;  %v595_v15 = vadd.f32 1.0, %v1705_v26 }
 0x23b   : > { %1716 = vrcp.f32 %v593_v22  ;;  %v605_v30 = vmul.f32 %v1707_v28, %v2150_v36  ;;  %v614_v36 = vld [vmem:[#allocation2 + $0x28] sm:$0xff] }
 0x23c   : > { %v1709_v23 = vpop.eup %1708  ;;  %1718 = vrcp.f32 %v595_v15 }
 0x23d   : > { %v1711_v17 = vpop.eup %1710  ;;  %v606_v29 = vmul.f32 %v1709_v23, %v548_v41  ;;  %v613_v41 = vld [vmem:[#allocation2 + $0x20] sm:$0xff] }
 0x23e   : > { %v607_v31 = vmul.f32 %v1711_v17, %v550_v45  ;;  %v615_v45 = vld [vmem:[#allocation2 + $0x30] sm:$0xff] }
 0x23f   : > { %v1543_v32 = vpack.c.bf16 %v606_v29, %v604_v27 }
 0x240   : > { %v1541_v33 = vpack.c.bf16 %v607_v31, %v605_v30  ;;  %v1713_v35 = vpop.eup %1712 }
 0x241   : > { %v608_v39 = vmul.f32 %v1713_v35, %v554_v50 }
 0x242   : > { %1542 = vmatprep.subr.bf16.mxu0 %v1541_v33 }
 0x243   : > { %1544 = vmatpush1.bf16.msra.mxu0 %v1543_v32 }
 0x244   : > { %v1715_v37 = vpop.eup %1714 }
 0x245   : > { %v1717_v38 = vpop.eup %1716  ;;  %v610_v40 = vmul.f32 %v1715_v37, %v560_v59 }
 0x246   : > { %v1719_v42 = vpop.eup %1718  ;;  %v609_v44 = vmul.f32 %v1717_v38, %v2154_v53 }
 0x247   : > { %v1547_v43 = vpack.c.bf16 %v610_v40, %v608_v39  ;;  %v611_v46 = vmul.f32 %v1719_v42, %v562_v62 }
 0x249   : > { %v1545_v34 = vpack.c.bf16 %v611_v46, %v609_v44 }
 0x24b   : > { %1546 = vmatprep.subr.bf16.mxu0 %v1545_v34 }
 0x24c   : > { %1548 = vmatpush1.bf16.msra.mxu0 %v1547_v43 }
 0x24f   : > { %1510 = vmatmul.mubr.msk.f32.vlgmr.msra.gmra.mrb[8].mxu0 %vm462_vm2, %v613_v41 }
 0x250   : > { %715 = vmatprep.mubr.f32.mxu0 %v1947_v0 }
 0x253   : > { %1511 = vmatmul.mubr.msk.f32.gmra.mrb[10].mxu0 %vm462_vm2, %v614_v36 }
 0x254   : > { %721 = vmatprep.mubr.f32.mxu0 %v1947_v0 }
 0x257   : > { %1512 = vmatmul.mubr.msk.f32.gmra.mrb[12].mxu0 %vm462_vm2, %v615_v45 }
 0x258   : > { %727 = vmatprep.mubr.f32.mxu0 %v1947_v0 }
 0x25b   : > { %1513 = vmatmul.mubr.msk.f32.gmra.mrb[14].mxu0 %vm462_vm2, %v616_v47 }
 0x25c   : > { %1049 = vmatprep.mubr.f32.mxu0 %v1947_v0 }
 0x322   : > { %v711_v50 = vpop.f32.mrb[8].mxu0 }
 0x323   : > { %v2172_v51 = vadd.f32 %v711_v50, %v619_v49  ;;  %v713_v52 = vpop.f32.mrb[9].mxu0 }
 0x324   : > { %v2174_v53 = vadd.f32 %v713_v52, %v619_v49 }
 0x325   : > { %v734_v55 = vsub.f32 0.0, %v2172_v51 }
 0x326   : > { %v735_v56 = vsub.f32 0.0, %v2174_v53  ;;  %v717_v57 = vpop.f32.mrb[10].mxu0 }
 0x327   : > { %v742_v58 = vmul.f32 1.442695, %v734_v55  ;;  %v718_v59 = vadd.f32 %v717_v57, %v623_v54  ;;  %v719_v60 = vpop.f32.mrb[11].mxu0 }
 0x328   : > { %v744_v62 = vmul.f32 1.442695, %v735_v56  ;;  %v720_v63 = vadd.f32 %v719_v60, %v623_v54 }
 0x329   : > { %1720 = vpow2.f32 %v742_v58  ;;  %v736_v1 = vsub.f32 0.0, %v718_v59 }
 0x32a   : > { %1722 = vpow2.f32 %v744_v62  ;;  %v737_v2 = vsub.f32 0.0, %v720_v63  ;;  %v723_v3 = vpop.f32.mrb[12].mxu0  ;;  %v783_v62 = vld [vmem:[#allocation2 + $0x40] sm:$0xff] }
 0x32b   : > { %v746_v5 = vmul.f32 1.442695, %v736_v1  ;;  %v2178_v9 = vadd.f32 %v723_v3, %v627_v61  ;;  %v725_v10 = vpop.f32.mrb[13].mxu0  ;;  %v785_v1 = vld [vmem:[#allocation2 + $0x50] sm:$0xff]  ;;  %v1952_v3 = vmov 4  }
 0x32c   : > { %v748_v11 = vmul.f32 1.442695, %v737_v2  ;;  %v726_v12 = vadd.f32 %v725_v10, %v627_v61  ;;  %v786_v2 = vld [vmem:[#allocation2 + $0x58] sm:$0xff]  ;;  %1650 = vset.pattern.permute.xlu1 %v1952_v3  ;;  %1651 = vset.pattern.permute.xlu0 %v1952_v3  ;;  %v793_v10 = vpop.permute.xlu1 %792 }
 0x32d   : > { %1724 = vpow2.f32 %v746_v5  ;;  %v738_v13 = vsub.f32 0.0, %v2178_v9  ;;  %958 = vperm.xlu1 %1650, %v2079_v4   ;;  %962 = vperm.xlu0 %1651, %v2093_v7   ;;  %v789_v5 = vpop.permute.xlu0 %788 }
 0x32e   : > { %1726 = vpow2.f32 %v748_v11  ;;  %v739_v16 = vsub.f32 0.0, %v726_v12  ;;  %v729_v18 = vpop.f32.mrb[14].mxu0 }
 0x32f   : > { %v750_v19 = vmul.f32 1.442695, %v738_v13  ;;  %v730_v20 = vadd.f32 %v729_v18, %v631_v14  ;;  %v731_v21 = vpop.f32.mrb[15].mxu0 }
 0x330   : > { %v752_v22 = vmul.f32 1.442695, %v739_v16  ;;  %v732_v24 = vadd.f32 %v731_v21, %v631_v14 }
 0x331   : > { %v740_v25 = vsub.f32 0.0, %v730_v20  ;;  %966 = vperm.xlu1 %1650, %v2088_v6  }
 0x332   : > { %1728 = vpow2.f32 %v752_v22  ;;  %v741_v26 = vsub.f32 0.0, %v732_v24 }
 0x333   : > { %v1721_v28 = vpop.eup %1720  ;;  %1730 = vpow2.f32 %v750_v19  ;;  %v754_v15 = vmul.f32 1.442695, %v740_v25 }
 0x334   : > { %v1723_v23 = vpop.eup %1722  ;;  %v758_v17 = vadd.f32 1.0, %v1721_v28  ;;  %v756_v27 = vmul.f32 1.442695, %v741_v26 }
 0x335   : > { %v759_v29 = vadd.f32 1.0, %v1723_v23  ;;  %1732 = vpow2.f32 %v754_v15  ;;  %970 = vperm.xlu1 %1650, %v2099_v8  }
 0x336   : > { %1734 = vrcp.f32 %v758_v17 }
 0x337   : > { %v1725_v30 = vpop.eup %1724  ;;  %1736 = vpow2.f32 %v756_v27 }
 0x338   : > { %v1727_v31 = vpop.eup %1726  ;;  %v760_v32 = vadd.f32 1.0, %v1725_v30  ;;  %1738 = vrcp.f32 %v759_v29 }
 0x339   : > { %v761_v33 = vadd.f32 1.0, %v1727_v31 }
 0x33a   : > { %1740 = vrcp.f32 %v760_v32  ;;  %v801_v32 = vpop.permute.xlu0 %800 }
 0x33b   : > { %1742 = vrcp.f32 %v761_v33 }
 0x33c   : > { %v1729_v35 = vpop.eup %1728 }
 0x33d   : > { %v1731_v37 = vpop.eup %1730  ;;  %v763_v39 = vadd.f32 1.0, %v1729_v35 }
 0x33e   : > { %v762_v40 = vadd.f32 1.0, %v1731_v37 }
 0x33f   : > { %v1733_v38 = vpop.eup %1732 }
 0x340   : > { %v764_v42 = vadd.f32 1.0, %v1733_v38  ;;  %v1735_v43 = vpop.eup %1734 }
 0x341   : > { %v1737_v44 = vpop.eup %1736  ;;  %v2189_v49 = vmul.f32 %v1735_v43, %v2172_v51 }
 0x342   : > { %1744 = vrcp.f32 %v764_v42  ;;  %v1739_v46 = vpop.eup %1738  ;;  %v765_v34 = vadd.f32 1.0, %v1737_v44 }
 0x343   : > { %1746 = vrcp.f32 %v763_v39  ;;  %v2184_v47 = vmul.f32 %v1739_v46, %v2174_v53 }
 0x344   : > { %v1741_v41 = vpop.eup %1740  ;;  %1748 = vrcp.f32 %v762_v40 }
 0x345   : > { %v1743_v36 = vpop.eup %1742  ;;  %v2181_v45 = vmul.f32 %v1741_v41, %v718_v59  ;;  %1750 = vrcp.f32 %v765_v34 }
 0x346   : > { %v2186_v48 = vmul.f32 %v1743_v36, %v720_v63  ;;  %v784_v63 = vld [vmem:[#allocation2 + $0x48] sm:$0xff] }
 0x347   : > { %v1551_v52 = vpack.c.bf16 %v2181_v45, %v2189_v49 }
 0x348   : > { %v1549_v50 = vpack.c.bf16 %v2186_v48, %v2184_v47 }
 0x34a   : > { %1550 = vmatprep.subr.bf16.mxu1 %v1549_v50 }
 0x34b   : > { %1552 = vmatpush1.bf16.msra.mxu1 %v1551_v52 }
 0x34c   : > { %v1745_v54 = vpop.eup %1744 }
 0x34d   : > { %v1747_v55 = vpop.eup %1746  ;;  %v2195_v58 = vmul.f32 %v1745_v54, %v730_v20 }
 0x34e   : > { %v1749_v56 = vpop.eup %1748  ;;  %v2197_v53 = vmul.f32 %v1747_v55, %v726_v12 }
 0x34f   : > { %v1751_v57 = vpop.eup %1750  ;;  %v2202_v51 = vmul.f32 %v1749_v56, %v2178_v9 }
 0x350   : > { %v2199_v59 = vmul.f32 %v1751_v57, %v732_v24  ;;  %v797_v24 = vpop.permute.xlu1 %796 }
 0x351   : > { %v1555_v61 = vpack.c.bf16 %v2195_v58, %v2202_v51 }
 0x352   : > { %v1553_v60 = vpack.c.bf16 %v2199_v59, %v2197_v53 }
 0x354   : > { %1554 = vmatprep.subr.bf16.mxu1 %v1553_v60 }
 0x355   : > { %1556 = vmatpush1.bf16.msra.mxu1 %v1555_v61 }
 0x358   : > { %1514 = vmatmul.mubr.msk.f32.vlgmr.msra.gmra.mrb[8].mxu1 %vm462_vm2, %v783_v62 }
 0x359   : > { %885 = vmatprep.mubr.f32.mxu1 %v1947_v0 }
 0x35c   : > { %1515 = vmatmul.mubr.msk.f32.gmra.mrb[10].mxu1 %vm462_vm2, %v784_v63 }
 0x35d   : > { %891 = vmatprep.mubr.f32.mxu1 %v1947_v0 }
 0x360   : > { %1516 = vmatmul.mubr.msk.f32.gmra.mrb[12].mxu1 %vm462_vm2, %v785_v1 }
 0x361   : > { %897 = vmatprep.mubr.f32.mxu1 %v1947_v0 }
 0x364   : > { %1517 = vmatmul.mubr.msk.f32.gmra.mrb[14].mxu1 %vm462_vm2, %v786_v2 }
 0x365   : > { %1227 = vmatprep.mubr.f32.mxu1 %v1947_v0 }
 0x42b   : > { %v881_v9 = vpop.f32.mrb[8].mxu1 }
 0x42c   : > { %v2220_v11 = vadd.f32 %v881_v9, %v789_v5  ;;  %v883_v12 = vpop.f32.mrb[9].mxu1 }
 0x42d   : > { %v2222_v13 = vadd.f32 %v883_v12, %v789_v5 }
 0x42e   : > { %v904_v14 = vsub.f32 0.0, %v2220_v11 }
 0x42f   : > { %v905_v16 = vsub.f32 0.0, %v2222_v13  ;;  %v887_v18 = vpop.f32.mrb[10].mxu1 }
 0x430   : > { %v912_v19 = vmul.f32 1.442695, %v904_v14  ;;  %v888_v20 = vadd.f32 %v887_v18, %v793_v10  ;;  %v889_v21 = vpop.f32.mrb[11].mxu1 }
 0x431   : > { %v914_v22 = vmul.f32 1.442695, %v905_v16  ;;  %v890_v25 = vadd.f32 %v889_v21, %v793_v10 }
 0x432   : > { %1752 = vpow2.f32 %v912_v19  ;;  %v906_v26 = vsub.f32 0.0, %v888_v20 }
 0x433   : > { %1754 = vpow2.f32 %v914_v22  ;;  %v907_v28 = vsub.f32 0.0, %v890_v25  ;;  %v893_v15 = vpop.f32.mrb[12].mxu1 }
 0x434   : > { %v916_v23 = vmul.f32 1.442695, %v906_v26  ;;  %v894_v17 = vadd.f32 %v893_v15, %v797_v24  ;;  %v895_v27 = vpop.f32.mrb[13].mxu1 }
 0x435   : > { %v918_v29 = vmul.f32 1.442695, %v907_v28  ;;  %v2226_v30 = vadd.f32 %v895_v27, %v797_v24 }
 0x436   : > { %1756 = vpow2.f32 %v916_v23  ;;  %v908_v31 = vsub.f32 0.0, %v894_v17 }
 0x437   : > { %1758 = vpow2.f32 %v918_v29  ;;  %v909_v33 = vsub.f32 0.0, %v2226_v30  ;;  %v899_v35 = vpop.f32.mrb[14].mxu1 }
 0x438   : > { %v920_v37 = vmul.f32 1.442695, %v908_v31  ;;  %v900_v38 = vadd.f32 %v899_v35, %v801_v32  ;;  %v901_v39 = vpop.f32.mrb[15].mxu1  ;;  %v959_v35 = vpop.permute.xlu1 %958 }
 0x439   : > { %v922_v40 = vmul.f32 1.442695, %v909_v33  ;;  %v902_v42 = vadd.f32 %v901_v39, %v801_v32 }
 0x43a   : > { %1760 = vpow2.f32 %v920_v37  ;;  %v910_v43 = vsub.f32 0.0, %v900_v38 }
 0x43b   : > { %1762 = vpow2.f32 %v922_v40  ;;  %v911_v44 = vsub.f32 0.0, %v902_v42 }
 0x43c   : > { %v1753_v46 = vpop.eup %1752  ;;  %v924_v34 = vmul.f32 1.442695, %v910_v43 }
 0x43d   : > { %v1755_v41 = vpop.eup %1754  ;;  %v928_v36 = vadd.f32 1.0, %v1753_v46  ;;  %v926_v50 = vmul.f32 1.442695, %v911_v44 }
 0x43e   : > { %v929_v52 = vadd.f32 1.0, %v1755_v41  ;;  %1764 = vpow2.f32 %v924_v34 }
 0x43f   : > { %1766 = vrcp.f32 %v928_v36 }
 0x440   : > { %v1757_v54 = vpop.eup %1756  ;;  %1768 = vpow2.f32 %v926_v50 }
 0x441   : > { %v1759_v55 = vpop.eup %1758  ;;  %v930_v56 = vadd.f32 1.0, %v1757_v54  ;;  %1770 = vrcp.f32 %v929_v52 }
 0x442   : > { %v931_v57 = vadd.f32 1.0, %v1759_v55 }
 0x443   : > { %1772 = vrcp.f32 %v930_v56 }
 0x444   : > { %v1761_v60 = vpop.eup %1760  ;;  %1774 = vrcp.f32 %v931_v57 }
 0x445   : > { %v1763_v61 = vpop.eup %1762  ;;  %v932_v62 = vadd.f32 1.0, %v1761_v60 }
 0x446   : > { %v933_v1 = vadd.f32 1.0, %v1763_v61 }
 0x447   : > { %1776 = vrcp.f32 %v932_v62 }
 0x448   : > { %v1765_v63 = vpop.eup %1764 }
 0x449   : > { %v934_v2 = vadd.f32 1.0, %v1765_v63  ;;  %v1767_v3 = vpop.eup %1766 }
 0x44a   : > { %v1769_v5 = vpop.eup %1768  ;;  %v944_v16 = vmul.f32 %v1767_v3, %v2220_v11 }
 0x44b   : > { %1778 = vrcp.f32 %v934_v2  ;;  %v1771_v9 = vpop.eup %1770  ;;  %v935_v10 = vadd.f32 1.0, %v1769_v5 }
 0x44c   : > { %1780 = vrcp.f32 %v933_v1  ;;  %v945_v19 = vmul.f32 %v1771_v9, %v2222_v13  ;;  %v954_v13 = vld [vmem:[#allocation2 + $0x68] sm:$0xff] }
 0x44d   : > { %v1773_v12 = vpop.eup %1772  ;;  %1782 = vrcp.f32 %v935_v10 }
 0x44e   : > { %v1775_v14 = vpop.eup %1774  ;;  %v946_v18 = vmul.f32 %v1773_v12, %v888_v20  ;;  %v953_v20 = vld [vmem:[#allocation2 + $0x60] sm:$0xff] }
 0x44f   : > { %v947_v21 = vmul.f32 %v1775_v14, %v890_v25  ;;  %v955_v25 = vld [vmem:[#allocation2 + $0x70] sm:$0xff] }
 0x450   : > { %v1559_v22 = vpack.c.bf16 %v946_v18, %v944_v16 }
 0x451   : > { %v1557_v24 = vpack.c.bf16 %v947_v21, %v945_v19  ;;  %v1777_v26 = vpop.eup %1776 }
 0x452   : > { %v948_v23 = vmul.f32 %v1777_v26, %v894_v17  ;;  %v956_v17 = vld [vmem:[#allocation2 + $0x78] sm:$0xff] }
 0x453   : > { %1558 = vmatprep.subr.bf16.mxu0 %v1557_v24 }
 0x454   : > { %1560 = vmatpush1.bf16.msra.mxu0 %v1559_v22 }
 0x455   : > { %v1779_v28 = vpop.eup %1778 }
 0x456   : > { %v1781_v15 = vpop.eup %1780  ;;  %v950_v27 = vmul.f32 %v1779_v28, %v900_v38 }
 0x457   : > { %v1783_v29 = vpop.eup %1782  ;;  %v949_v32 = vmul.f32 %v1781_v15, %v2226_v30  ;;  %v1953_v30 = vmov 5  }
 0x458   : > { %v1563_v31 = vpack.c.bf16 %v950_v27, %v948_v23  ;;  %v951_v33 = vmul.f32 %v1783_v29, %v902_v42  ;;  %1652 = vset.pattern.permute.xlu0 %v1953_v30  ;;  %1653 = vset.pattern.permute.xlu1 %v1953_v30  ;;  %v963_v42 = vpop.permute.xlu0 %962 }
 0x459   : > { %1136 = vperm.xlu0 %1652, %v2079_v4   ;;  %1140 = vperm.xlu1 %1653, %v2093_v7  }
 0x45a   : > { %v1561_v11 = vpack.c.bf16 %v951_v33, %v949_v32 }
 0x45c   : > { %1562 = vmatprep.subr.bf16.mxu0 %v1561_v11 }
 0x45d   : > { %1564 = vmatpush1.bf16.msra.mxu0 %v1563_v31  ;;  %1144 = vperm.xlu1 %1653, %v2088_v6   ;;  %v967_v6 = vpop.permute.xlu1 %966 }
 0x45e   : > { %1148 = vperm.xlu0 %1652, %v2099_v8  }
 0x460   : > { %1518 = vmatmul.mubr.msk.f32.vlgmr.msra.gmra.mrb[16].mxu0 %vm462_vm2, %v953_v20 }
 0x461   : > { %1055 = vmatprep.mubr.f32.mxu0 %v1947_v0 }
 0x464   : > { %1519 = vmatmul.mubr.msk.f32.gmra.mrb[18].mxu0 %vm462_vm2, %v954_v13 }
 0x465   : > { %1061 = vmatprep.mubr.f32.mxu0 %v1947_v0 }
 0x468   : > { %1520 = vmatmul.mubr.msk.f32.gmra.mrb[20].mxu0 %vm462_vm2, %v955_v25 }
 0x469   : > { %1067 = vmatprep.mubr.f32.mxu0 %v1947_v0 }
 0x46c   : > { %1521 = vmatmul.mubr.msk.f32.gmra.mrb[22].mxu0 %vm462_vm2, %v956_v17 }
 0x46d   : > { %1374 = vmatprep.mubr.f32.mxu0 %v1947_v0 }
 0x533   : > { %v1051_v37 = vpop.f32.mrb[16].mxu0 }
 0x534   : > { %v1052_v38 = vadd.f32 %v1051_v37, %v959_v35  ;;  %v1053_v39 = vpop.f32.mrb[17].mxu0 }
 0x535   : > { %v1054_v40 = vadd.f32 %v1053_v39, %v959_v35 }
 0x536   : > { %v2245_v43 = vadd.f32 %v1052_v38, %v2189_v49 }
 0x537   : > { %v2248_v44 = vadd.f32 %v1054_v40, %v2184_v47  ;;  %v1057_v46 = vpop.f32.mrb[18].mxu0 }
 0x538   : > { %v1082_v4 = vsub.f32 0.0, %v2245_v43  ;;  %v1058_v7 = vadd.f32 %v1057_v46, %v963_v42  ;;  %v1059_v34 = vpop.f32.mrb[19].mxu0 }
 0x539   : > { %v1083_v8 = vsub.f32 0.0, %v2248_v44  ;;  %v1060_v41 = vadd.f32 %v1059_v34, %v963_v42 }
 0x53a   : > { %v1090_v36 = vmul.f32 1.442695, %v1082_v4  ;;  %v2253_v50 = vadd.f32 %v1058_v7, %v2181_v45  ;;  %v971_v45 = vpop.permute.xlu1 %970 }
 0x53b   : > { %v1092_v52 = vmul.f32 1.442695, %v1083_v8  ;;  %v2256_v49 = vadd.f32 %v1060_v41, %v2186_v48  ;;  %v1063_v54 = vpop.f32.mrb[20].mxu0 }
 0x53c   : > { %1784 = vpow2.f32 %v1090_v36  ;;  %v1084_v47 = vsub.f32 0.0, %v2253_v50  ;;  %v1064_v55 = vadd.f32 %v1063_v54, %v967_v6  ;;  %v1065_v56 = vpop.f32.mrb[21].mxu0  ;;  %v1133_v54 = vld [vmem:[#allocation2 + $0x90] sm:$0xff] }
 0x53d   : > { %1786 = vpow2.f32 %v1092_v52  ;;  %v1085_v57 = vsub.f32 0.0, %v2256_v49  ;;  %v1066_v60 = vadd.f32 %v1065_v56, %v967_v6  ;;  %v1954_v56 = vmov 6  }
 0x53e   : > { %v1094_v61 = vmul.f32 1.442695, %v1084_v47  ;;  %v2261_v62 = vadd.f32 %v1064_v55, %v2202_v51  ;;  %v1134_v47 = vld [vmem:[#allocation2 + $0x98] sm:$0xff]  ;;  %v1301_v55 = vld [vmem:[%s2353_s4] sm:$0x1]  ;;  %1654 = vset.pattern.permute.xlu1 %v1954_v56  ;;  %1655 = vset.pattern.permute.xlu0 %v1954_v56 }
 0x53f   : > { %v1096_v63 = vmul.f32 1.442695, %v1085_v57  ;;  %v2264_v1 = vadd.f32 %v1066_v60, %v2197_v53  ;;  %v1069_v48 = vpop.f32.mrb[22].mxu0  ;;  %1304 = vperm.xlu1 %1654, %v1301_v55   ;;  %v1137_v57 = vpop.permute.xlu0 %1136 }
 0x540   : > { %1788 = vpow2.f32 %v1094_v61  ;;  %v1086_v2 = vsub.f32 0.0, %v2261_v62  ;;  %v1070_v3 = vadd.f32 %v1069_v48, %v971_v45  ;;  %v1071_v5 = vpop.f32.mrb[23].mxu0  ;;  %v1141_v61 = vpop.permute.xlu1 %1140 }
 0x541   : > { %1790 = vpow2.f32 %v1096_v63  ;;  %v1087_v9 = vsub.f32 0.0, %v2264_v1  ;;  %v1072_v10 = vadd.f32 %v1071_v5, %v971_v45 }
 0x542   : > { %v1098_v12 = vmul.f32 1.442695, %v1086_v2  ;;  %v1080_v14 = vadd.f32 %v1070_v3, %v2195_v58 }
 0x543   : > { %v1100_v51 = vmul.f32 1.442695, %v1087_v9  ;;  %v1081_v16 = vadd.f32 %v1072_v10, %v2199_v59 }
 0x544   : > { %1792 = vpow2.f32 %v1098_v12  ;;  %v1088_v18 = vsub.f32 0.0, %v1080_v14  ;;  %v1145_v10 = vpop.permute.xlu1 %1144 }
 0x545   : > { %1794 = vpow2.f32 %v1100_v51  ;;  %v1089_v53 = vsub.f32 0.0, %v1081_v16 }
 0x546   : > { %v1785_v19 = vpop.eup %1784  ;;  %v1102_v21 = vmul.f32 1.442695, %v1088_v18 }
 0x547   : > { %v1787_v22 = vpop.eup %1786  ;;  %v1106_v24 = vadd.f32 1.0, %v1785_v19  ;;  %v1104_v26 = vmul.f32 1.442695, %v1089_v53 }
 0x548   : > { %v1107_v28 = vadd.f32 1.0, %v1787_v22  ;;  %1796 = vpow2.f32 %v1102_v21 }
 0x549   : > { %1798 = vrcp.f32 %v1106_v24 }
 0x54a   : > { %v1789_v15 = vpop.eup %1788  ;;  %1800 = vpow2.f32 %v1104_v26  ;;  %v1149_v26 = vpop.permute.xlu0 %1148 }
 0x54b   : > { %v1791_v23 = vpop.eup %1790  ;;  %v1108_v27 = vadd.f32 1.0, %v1789_v15  ;;  %1802 = vrcp.f32 %v1107_v28 }
 0x54c   : > { %v1109_v58 = vadd.f32 1.0, %v1791_v23 }
 0x54d   : > { %1804 = vrcp.f32 %v1108_v27 }
 0x54e   : > { %v1793_v59 = vpop.eup %1792  ;;  %1806 = vrcp.f32 %v1109_v58 }
 0x54f   : > { %v1795_v29 = vpop.eup %1794  ;;  %v1110_v31 = vadd.f32 1.0, %v1793_v59 }
 0x550   : > { %v1111_v33 = vadd.f32 1.0, %v1795_v29 }
 0x551   : > { %1808 = vrcp.f32 %v1110_v31 }
 0x552   : > { %v1797_v32 = vpop.eup %1796 }
 0x553   : > { %v1112_v11 = vadd.f32 1.0, %v1797_v32  ;;  %v1799_v20 = vpop.eup %1798 }
 0x554   : > { %v1801_v13 = vpop.eup %1800  ;;  %v1122_v37 = vmul.f32 %v1799_v20, %v2245_v43 }
 0x555   : > { %1810 = vrcp.f32 %v1112_v11  ;;  %v1803_v25 = vpop.eup %1802  ;;  %v1113_v17 = vadd.f32 1.0, %v1801_v13 }
 0x556   : > { %1812 = vrcp.f32 %v1111_v33  ;;  %v1123_v39 = vmul.f32 %v1803_v25, %v2248_v44  ;;  %v1131_v44 = vld [vmem:[#allocation2 + $0x80] sm:$0xff] }
 0x557   : > { %v1805_v30 = vpop.eup %1804  ;;  %1814 = vrcp.f32 %v1113_v17 }
 0x558   : > { %v1807_v35 = vpop.eup %1806  ;;  %v1124_v38 = vmul.f32 %v1805_v30, %v2253_v50 }
 0x559   : > { %v1125_v40 = vmul.f32 %v1807_v35, %v2256_v49  ;;  %v1132_v49 = vld [vmem:[#allocation2 + $0x88] sm:$0xff] }
 0x55a   : > { %v1567_v42 = vpack.c.bf16 %v1124_v38, %v1122_v37 }
 0x55b   : > { %v1565_v46 = vpack.c.bf16 %v1125_v40, %v1123_v39  ;;  %v1809_v4 = vpop.eup %1808 }
 0x55c   : > { %v1126_v6 = vmul.f32 %v1809_v4, %v2261_v62 }
 0x55d   : > { %1566 = vmatprep.subr.bf16.mxu1 %v1565_v46 }
 0x55e   : > { %1568 = vmatpush1.bf16.msra.mxu1 %v1567_v42 }
 0x55f   : > { %v1811_v7 = vpop.eup %1810 }
 0x560   : > { %v1813_v34 = vpop.eup %1812  ;;  %v1128_v8 = vmul.f32 %v1811_v7, %v1080_v14 }
 0x561   : > { %v1815_v41 = vpop.eup %1814  ;;  %v1127_v43 = vmul.f32 %v1813_v34, %v2264_v1 }
 0x562   : > { %v1571_v36 = vpack.c.bf16 %v1128_v8, %v1126_v6  ;;  %v1129_v50 = vmul.f32 %v1815_v41, %v1081_v16 }
 0x564   : > { %v1569_v52 = vpack.c.bf16 %v1129_v50, %v1127_v43 }
 0x566   : > { %1570 = vmatprep.subr.bf16.mxu1 %v1569_v52 }
 0x567   : > { %1572 = vmatpush1.bf16.msra.mxu1 %v1571_v36 }
 0x56a   : > { %1522 = vmatmul.mubr.msk.f32.vlgmr.msra.gmra.mrb[16].mxu1 %vm462_vm2, %v1131_v44 }
 0x56b   : > { %1233 = vmatprep.mubr.f32.mxu1 %v1947_v0 }
 0x56e   : > { %1523 = vmatmul.mubr.msk.f32.gmra.mrb[18].mxu1 %vm462_vm2, %v1132_v49 }
 0x56f   : > { %1239 = vmatprep.mubr.f32.mxu1 %v1947_v0 }
 0x572   : > { %1524 = vmatmul.mubr.msk.f32.gmra.mrb[20].mxu1 %vm462_vm2, %v1133_v54 }
 0x573   : > { %1245 = vmatprep.mubr.f32.mxu1 %v1947_v0 }
 0x576   : > { %1525 = vmatmul.mubr.msk.f32.gmra.mrb[22].mxu1 %vm462_vm2, %v1134_v47 }
 0x63d   : > { %v1229_v60 = vpop.f32.mrb[16].mxu1 }
 0x63e   : > { %v2286_v62 = vadd.f32 %v1229_v60, %v1137_v57  ;;  %v1231_v45 = vpop.f32.mrb[17].mxu1 }
 0x63f   : > { %v2288_v63 = vadd.f32 %v1231_v45, %v1137_v57 }
 0x640   : > { %v1252_v0 = vsub.f32 0.0, %v2286_v62 }
 0x641   : > { %v1253_v1 = vsub.f32 0.0, %v2288_v63  ;;  %v1235_v48 = vpop.f32.mrb[18].mxu1 }
 0x642   : > { %v1260_v2 = vmul.f32 1.442695, %v1252_v0  ;;  %v1236_v3 = vadd.f32 %v1235_v48, %v1141_v61  ;;  %v1237_v5 = vpop.f32.mrb[19].mxu1 }
 0x643   : > { %v1262_v9 = vmul.f32 1.442695, %v1253_v1  ;;  %v1238_v12 = vadd.f32 %v1237_v5, %v1141_v61  ;;  %v1387_v5 = vlaneseq }
 0x644   : > { %1816 = vpow2.f32 %v1260_v2  ;;  %v1254_v14 = vsub.f32 0.0, %v1236_v3  ;;  %v1955_v2 = vmov 1966171168  }
 0x645   : > { %1818 = vpow2.f32 %v1262_v9  ;;  %v1255_v51 = vsub.f32 0.0, %v1238_v12  ;;  %v1241_v16 = vpop.f32.mrb[20].mxu1  ;;  %v1305_v9 = vpop.permute.xlu1 %1304  ;;  %vm1401_vm3 = vcmp.lt.s32.totalorder %v1387_v5, 256 }
 0x646   : > { %v1264_v18 = vmul.f32 1.442695, %v1254_v14  ;;  %v1242_v53 = vadd.f32 %v1241_v16, %v1145_v10  ;;  %v1243_v19 = vpop.f32.mrb[21].mxu1 }
 0x647   : > { %v1266_v21 = vmul.f32 1.442695, %v1255_v51  ;;  %v2292_v22 = vadd.f32 %v1243_v19, %v1145_v10 }
 0x648   : > { %1820 = vpow2.f32 %v1264_v18  ;;  %v1256_v24 = vsub.f32 0.0, %v1242_v53 }
 0x649   : > { %1822 = vpow2.f32 %v1266_v21  ;;  %v1257_v28 = vsub.f32 0.0, %v2292_v22  ;;  %v1247_v15 = vpop.f32.mrb[22].mxu1 }
 0x64a   : > { %v1268_v23 = vmul.f32 1.442695, %v1256_v24  ;;  %v1248_v27 = vadd.f32 %v1247_v15, %v1149_v26  ;;  %v1249_v58 = vpop.f32.mrb[23].mxu1 }
 0x64b   : > { %v1270_v59 = vmul.f32 1.442695, %v1257_v28  ;;  %v1250_v29 = vadd.f32 %v1249_v58, %v1149_v26 }
 0x64c   : > { %1824 = vpow2.f32 %v1268_v23  ;;  %v1258_v31 = vsub.f32 0.0, %v1248_v27 }
 0x64d   : > { %1826 = vpow2.f32 %v1270_v59  ;;  %v1259_v32 = vsub.f32 0.0, %v1250_v29 }
 0x64e   : > { %v1817_v33 = vpop.eup %1816  ;;  %v1272_v11 = vmul.f32 1.442695, %v1258_v31 }
 0x64f   : > { %v1819_v20 = vpop.eup %1818  ;;  %v1276_v13 = vadd.f32 1.0, %v1817_v33  ;;  %v1274_v25 = vmul.f32 1.442695, %v1259_v32 }
 0x650   : > { %v1277_v17 = vadd.f32 1.0, %v1819_v20  ;;  %1828 = vpow2.f32 %v1272_v11 }
 0x651   : > { %1830 = vrcp.f32 %v1276_v13 }
 0x652   : > { %v1821_v30 = vpop.eup %1820  ;;  %1832 = vpow2.f32 %v1274_v25 }
 0x653   : > { %v1823_v35 = vpop.eup %1822  ;;  %v1278_v37 = vadd.f32 1.0, %v1821_v30  ;;  %1834 = vrcp.f32 %v1277_v17 }
 0x654   : > { %v1279_v38 = vadd.f32 1.0, %v1823_v35 }
 0x655   : > { %1836 = vrcp.f32 %v1278_v37 }
 0x656   : > { %v1825_v39 = vpop.eup %1824  ;;  %1838 = vrcp.f32 %v1279_v38 }
 0x657   : > { %v1827_v40 = vpop.eup %1826  ;;  %v1280_v42 = vadd.f32 1.0, %v1825_v39 }
 0x658   : > { %v1281_v4 = vadd.f32 1.0, %v1827_v40 }
 0x659   : > { %1840 = vrcp.f32 %v1280_v42 }
 0x65a   : > { %v1829_v46 = vpop.eup %1828 }
 0x65b   : > { %v1282_v7 = vadd.f32 1.0, %v1829_v46  ;;  %v1831_v34 = vpop.eup %1830 }
 0x65c   : > { %v1833_v6 = vpop.eup %1832  ;;  %v1292_v50 = vmul.f32 %v1831_v34, %v2286_v62 }
 0x65d   : > { %1842 = vrcp.f32 %v1282_v7  ;;  %v1835_v8 = vpop.eup %1834  ;;  %v1283_v41 = vadd.f32 1.0, %v1833_v6 }
 0x65e   : > { %1844 = vrcp.f32 %v1281_v4  ;;  %v1293_v44 = vmul.f32 %v1835_v8, %v2288_v63  ;;  %v1300_v63 = vld [vmem:[%s2352_s3] sm:$0x1] }
 0x65f   : > { %v1837_v36 = vpop.eup %1836  ;;  %1846 = vrcp.f32 %v1283_v41 }
 0x660   : > { %v1839_v43 = vpop.eup %1838  ;;  %v1294_v52 = vmul.f32 %v1837_v36, %v1236_v3  ;;  %v1385_v3 = vunpack.c.l.s4 %v1955_v2 }
 0x661   : > { %v1295_v49 = vmul.f32 %v1839_v43, %v1238_v12  ;;  %v1388_v12 = vshrl.u32 %v1387_v5, 7 }
 0x662   : > { %v1575_v54 = vpack.c.bf16 %v1294_v52, %v1292_v50  ;;  %v1386_v10 = vunpack.c.0.s8 %v1385_v3 }
 0x663   : > { %v1573_v47 = vpack.c.bf16 %v1295_v49, %v1293_v44  ;;  %v1841_v55 = vpop.eup %1840 }
 0x664   : > { %v1296_v60 = vmul.f32 %v1841_v55, %v1242_v53  ;;  %v1389_v53 = vsub.s32 %v1386_v10, %v1388_v12 }
 0x665   : > { %1574 = vmatprep.subr.bf16.mxu0 %v1573_v47 }
 0x666   : > { %1576 = vmatpush1.bf16.msra.mxu0 %v1575_v54 }
 0x667   : > { %v1843_v56 = vpop.eup %1842 }
 0x668   : > { %v1845_v57 = vpop.eup %1844  ;;  %v1298_v61 = vmul.f32 %v1843_v56, %v1248_v27 }
 0x669   : > { %v1847_v45 = vpop.eup %1846  ;;  %v1297_v1 = vmul.f32 %v1845_v57, %v2292_v22 }
 0x66a   : > { %v1579_v0 = vpack.c.bf16 %v1298_v61, %v1296_v60  ;;  %v1299_v62 = vmul.f32 %v1847_v45, %v1250_v29 }
 0x66c   : > { %v1577_v48 = vpack.c.bf16 %v1299_v62, %v1297_v1 }
 0x66e   : > { %1578 = vmatprep.subr.bf16.mxu0 %v1577_v48 }
 0x66f   : > { %1580 = vmatpush1.bf16.msra.mxu0 %v1579_v0 }
 0x672   : > { %1526 = vmatmul.mubr.msk.f32.vlgmr.msra.gmra.mrb[24].mxu0 %vm462_vm2, %v1300_v63 }
 0x745   : > { %v1376_v14 = vpop.f32.mrb[24].mxu0 }
 0x746   : > { %v1377_v51 = vadd.f32 %v1376_v14, %v1305_v9  ;;  %v1378_v16 = vpop.f32.mrb[25].mxu0 }
 0x747   : > { %v1379_v18 = vadd.f32 %v1378_v16, %v1305_v9 }
 0x749   : > { %v1383_v19 = vcombine.low %v1377_v51, %v1379_v18 }
 0x74b   : > { %v1390_v21 = vrot.slane %v1383_v19, %v1389_v53 }
 0x74d   : > { %v1397_v22 = vrot.slane %v1390_v21, %v1389_v53 }
 0x74f   : > { %1403 = vst.msk [vmem:[%s233_s17] sm:$0x3] %vm1401_vm3, %v1397_v22 }
 0x750   : > { %1889 = shalt.err (!%p1886_p7)
}
 0x751   : > { %s1890_s10 = scalar_lea.hbm %s2307_s6, 32  ;;  %s1894_s13 = scalar_lea.hbm %s2354_s5, 64 }
 0x752   : > { %p1891_p8 = scmp.ne.s32.totalorder %s2307_s6, %s1890_s10  ;;  %p1895_p1 = scmp.lt.u32.totalorder %s2307_s6, %s2354_s5 }
 0x753   : > { %p1896_p0 = scmp.lt.u32.totalorder %s1894_s13, %s1890_s10  ;;  %p1898_p6 = scmp.lt.u32.totalorder %s1890_s10, %s2307_s6 }
 0x754   : > { %p1892_p11 = pnand %p1891_p8, %p2365_p9 }
 0x755   : > { %p1897_p5 = por %p1896_p0, %p1895_p1 }
 0x756   : > { %p1893_p13 = pneg %p1892_p11 }
 0x757   : > { %p1899_p10 = por %p1898_p6, %p1897_p5 }
 0x759   : > { %p1900_p12 = pnand %p1899_p10, %p1893_p13 }
 0x75b   : > { %1903 = shalt.err (!%p1900_p12)
}
 0x75c   : > { %1585 = dma.vmem_to_hbm [thread:$0]  (%p2365_p9), %s2309_s23, 32, %s2307_s6, %s1405_s30  }
 0x75d PF: > { %p1597_p2 = scmp.ge.s32.totalorder %s1942_s21, 2  ;;  %s1431_s16 = sand.u32 1, %s1930_s18  }
 0x75e   : > { %p2366_p3 = scmp.ne.s32.totalorder %s2359_s29, 0  ;;  %s1432_s17 = scalar_lea.sflag [#allocation4], %s1431_s16 }
 0x760   : > { %p1592_p4 = pnand %p1597_p2, %p2366_p3 }
 0x762   : > { %1925 = dma.done.wait (!%p1592_p4), %s1432_s17, 32  }
 0x763   : > { %1927 = vsyncadd (!%p1592_p4), %s1432_s17, 4294967264  ;;  %p16_p7 = scmp.ge.s32.totalorder %s2012_s24, 4   ;;  %s2367_s18 = smov %s1934_s19 }
 0x764   : > { %s2368_s19 = smov %s1938_s20  ;;  %s2369_s20 = smov %s2023_s27 }
 0x765   : > { %s2370_s21 = smov %s2012_s24  ;;  %18 = sbr.rel (!%p16_p7) target bundleno = 4 (0x4), region = 84 }
 0x76c   :  { %1437 = vsyncpa [#allocation3], 1 }
 0x76d   :  { %1439 = vsyncpa [#allocation3 + $0x1], 1 }
 0x76e   :  { %1440 = vsyncpa [#allocation4], 1 }
 0x76f   :  { %1442 = vsyncpa [#allocation4 + $0x1], 1 }

</bundles_post_ra>
